<compile_context>
chip_gen: v7x
topology: tpu7x:2x2x1
jax: 0.10.0
libtpu: 0.0.40
codegen_flags: <defaults>
</compile_context>

<pallas_src>
import jax
import jax.numpy as jnp
from jax.experimental import pallas as pl
from jax.experimental.pallas import tpu as pltpu

# Fixed module hyper-parameters (from Model.__init__)
CIN, COUT = 256, 256
KH, KW = 4, 3
SH, SW = 2, 2
PH, PW = 0, 1


def _round_up(x, m):
    return (x + m - 1) // m * m


def _fused_kernel(x_ref, w_ref, b_ref, o_ref):
    # x_ref: (1, TP, 2*W*Cin)     bf16   lanes = [current input row | previous input row]
    # w_ref: (2*W*Cin, 2*OW*Cout) bf16   rows match x lanes, cols = [even out row | odd out row]
    # b_ref: (1, 2*OW*Cout)       f32
    # o_ref: (1, TP, 2*OW*Cout)   f32    row p = [output row 2p | output row 2p+1]
    acc = jnp.dot(x_ref[0], w_ref[...], preferred_element_type=jnp.float32)   # MXU, f32 acc
    o_ref[0] = jnp.maximum(acc + b_ref[...], 0.0)                             # bias + 2nd ReLU


def model_forward(x_nchw, wt, bias, *, tile_pairs=256):
    """ReLU -> ConvTranspose2d(256,256,[4,3],stride=[2,2],padding=[0,1]) -> ReLU.

    x_nchw: (N, 256, H, W) float32 (PyTorch NCHW).  Returns (N, 256, OH, OW) float32.
    """
    N, Cin, H, W = x_nchw.shape
    Cout = wt.shape[1]
    OH = (H - 1) * SH - 2 * PH + KH          # = 2*H + 2
    OW = (W - 1) * SW - 2 * PW + KW          # = 2*W - 1
    NP = OH // 2                             # output row pairs; OH == 2*NP == 2*(H+1)
    WC = W * Cin
    OWC = OW * Cout
    KD = 2 * WC                              # contraction dim: [current | previous] row features
    ND = 2 * OWC                             # output lanes:    [even     | odd     ] row outputs

    TP = min(tile_pairs, _round_up(NP, 16))  # row pairs per grid step (16-aligned sublanes)
    NP_pad = _round_up(NP, TP)
    NT = NP_pad // TP

    # ---- glue: first ReLU + NCHW -> (N, H, W*Cin) + bf16 cast (single fused XLA pass) ----
    xh = jnp.maximum(x_nchw.astype(jnp.float32), 0.0)
    xh = jnp.transpose(xh, (0, 2, 3, 1)).reshape(N, H, WC).astype(jnp.bfloat16)
    # row p of xcat = [ x[p] (zero for p >= H) | x[p-1] (zero for p == 0 or p > H) ]
    cur = jnp.pad(xh, ((0, 0), (0, NP_pad - H), (0, 0)))
    prev = jnp.pad(xh, ((0, 0), (1, NP_pad - H - 1), (0, 0)))
    xcat = jnp.concatenate([cur, prev], axis=-1)                       # (N, NP_pad, KD) bf16

    # ---- glue: merged weight matrix (vectorized, no nested .at[].set loops) ----
    # kw needed so that ow = SW*w - PW + kw  ->  kw = ow - SW*w + PW  (masked if out of range)
    kw_idx = jnp.arange(OW)[None, :] - SW * jnp.arange(W)[:, None] + PW      # (W, OW)
    valid = (kw_idx >= 0) & (kw_idx < KW)
    g = jnp.take(wt.astype(jnp.float32), jnp.clip(kw_idx, 0, KW - 1), axis=3)  # (Cin,Cout,KH,W,OW)
    g = jnp.where(valid[None, None, None, :, :], g, 0.0)
    M = jnp.transpose(g, (2, 3, 0, 4, 1)).reshape(KH, WC, OWC)   # per kernel-row (W*Cin, OW*Cout)
    # even rows (oh=2p):  kh=0 from x[p], kh=2 from x[p-1];  odd rows: kh=1 / kh=3
    wcat = jnp.concatenate(
        [jnp.concatenate([M[0], M[1]], axis=1),    # "current row"  -> [even | odd]
         jnp.concatenate([M[2], M[3]], axis=1)],   # "previous row" -> [even | odd]
        axis=0).astype(jnp.bfloat16)               # (KD, ND)
    bias_row = jnp.tile(bias.astype(jnp.float32), 2 * OW).reshape(1, ND)

    out_pairs = pl.pallas_call(
        _fused_kernel,
        out_shape=jax.ShapeDtypeStruct((N, NP_pad, ND), jnp.float32),
        grid=(N, NT),
        in_specs=[
            pl.BlockSpec((1, TP, KD), lambda n, t: (n, t, 0)),   # streamed, double-buffered
            pl.BlockSpec((KD, ND), lambda n, t: (0, 0)),         # constant index -> resident
            pl.BlockSpec((1, ND), lambda n, t: (0, 0)),          # constant index -> resident
        ],
        out_specs=pl.BlockSpec((1, TP, ND), lambda n, t: (n, t, 0)),  # lane-dense (ND >= 512)
        compiler_params=pltpu.CompilerParams(
            dimension_semantics=("parallel", "parallel"),   # batch + row tiles both parallel
            vmem_limit_bytes=32 * 1024 * 1024,              # explicit; actual use ~2.5 MB/step
        ),
    )(xcat, wcat, bias_row)

    # pair-major -> interleaved rows is a free (row-major) reshape; drop padded pairs.
    out = out_pairs.reshape(N, 2 * NP_pad, OWC)[:, :OH, :]
    out = out.reshape(N, OH, OW, Cout)
    return jnp.transpose(out, (0, 3, 1, 2))                     # back to NCHW


def reference_forward(x, wt, bias):
    """Direct scatter-style definition of the same module (independent f32 check)."""
    N, Cin, H, W = x.shape
    Cout = wt.shape[1]
    OH = (H - 1) * SH - 2 * PH + KH
    OW = (W - 1) * SW - 2 * PW + KW
    xr = jnp.maximum(x, 0.0)
    buf = jnp.zeros((N, Cout, OH + KH, OW + KW + 2), jnp.float32)
    for kh in range(KH):
        for kw in range(KW):
            contrib = jnp.einsum('nchw,cd->ndhw', xr, wt[:, :, kh, kw])
            buf = buf.at[:, :, kh:kh + SH * H:SH, kw:kw + SW * W:SW].add(contrib)
    out = buf[:, :, PH:PH + OH, PW:PW + OW] + bias[None, :, None, None]
    return jnp.maximum(out, 0.0)


if __name__ == "__main__":
    key = jax.random.PRNGKey(0)
    kx, kw_, kb = jax.random.split(key, 3)

    # Small shape consistent with the module's intended input (1, 256, 1792, 1): shrink H.
    N, H, W = 1, 64, 1
    x = jax.random.normal(kx, (N, CIN, H, W), jnp.float32)

    # Deterministic parameter init (PyTorch-style default bounds):
    #   weight: (in_channels, out_channels, KH, KW) = (256, 256, 4, 3), bias: (256,)
    bound = 1.0 / (CIN * KH * KW) ** 0.5
    wt = jax.random.uniform(kw_, (CIN, COUT, KH, KW), jnp.float32, -bound, bound)
    bias = jax.random.uniform(kb, (COUT,), jnp.float32, -bound, bound)

    # Small tile so the test exercises the multi-tile grid + padded boundary path.
    out = jax.block_until_ready(model_forward(x, wt, bias, tile_pairs=32))
    ref = jax.block_until_ready(reference_forward(x, wt, bias))

    OH = (H - 1) * SH - 2 * PH + KH
    OW = (W - 1) * SW - 2 * PW + KW
    assert out.shape == (N, COUT, OH, OW)
    # bf16 MXU operands (f32 accumulation) => ~1e-3 relative error vs the f32 reference.
    max_err = float(jnp.max(jnp.abs(out - ref)))
    assert jnp.allclose(out, ref, atol=2e-2, rtol=2e-2), max_err
    print("KERNEL_OK")
</pallas_src>

<mosaic_0001>
module attributes {stable_mosaic.version = 11 : i64} {
  func.func @_fused_kernel(%arg0: i32, %arg1: i32, %arg2: memref<1x32x512xbf16, #tpu.memory_space<vmem>>, %arg3: memref<512x512xbf16, #tpu.memory_space<vmem>>, %arg4: memref<1x512xf32, #tpu.memory_space<vmem>>, %arg5: memref<1x32x512xf32, #tpu.memory_space<vmem>>) attributes {dimension_semantics = [#tpu.dimension_semantics<parallel>, #tpu.dimension_semantics<parallel>], iteration_bounds = array<i64: 1, 3>, scalar_prefetch = 0 : i64, scratch_operands = 0 : i64, tpu.core_type = #tpu.core_type<tc>, window_params = [{transform_indices = @transform_0, window_bounds = array<i64: 1, 32, 512>}, {pipeline_mode = #tpu.pipeline_mode<synchronous>, transform_indices = @transform_1, window_bounds = array<i64: 512, 512>}, {pipeline_mode = #tpu.pipeline_mode<synchronous>, transform_indices = @transform_2, window_bounds = array<i64: 1, 512>}, {transform_indices = @transform_3, window_bounds = array<i64: 1, 32, 512>}]} {
    %c0 = arith.constant 0 : index
    %c0_0 = arith.constant 0 : index
    %c0_1 = arith.constant 0 : index
    %0 = vector.load %arg2[%c0, %c0_0, %c0_1] : memref<1x32x512xbf16, #tpu.memory_space<vmem>>, vector<1x32x512xbf16>
    %1 = vector.shape_cast %0 : vector<1x32x512xbf16> to vector<32x512xbf16>
    %c0_2 = arith.constant 0 : index
    %c0_3 = arith.constant 0 : index
    %2 = vector.load %arg3[%c0_2, %c0_3] : memref<512x512xbf16, #tpu.memory_space<vmem>>, vector<512x512xbf16>
    %cst = arith.constant dense<0.000000e+00> : vector<32x512xf32>
    %3 = tpu.matmul %1, %2, %cst {dimension_numbers = #tpu.dot_dimension_numbers<[1], [0], [0], [1], [0, 0, 1, 1], [], []>} : vector<32x512xbf16>, vector<512x512xbf16>, vector<32x512xf32> -> vector<32x512xf32>
    %c0_4 = arith.constant 0 : index
    %c0_5 = arith.constant 0 : index
    %4 = vector.load %arg4[%c0_4, %c0_5] : memref<1x512xf32, #tpu.memory_space<vmem>>, vector<1x512xf32>
    %5 = vector.broadcast %4 : vector<1x512xf32> to vector<32x512xf32>
    %6 = arith.addf %3, %5 : vector<32x512xf32>
    %cst_6 = arith.constant 0.000000e+00 : f32
    %7 = vector.broadcast %cst_6 : f32 to vector<32x512xf32>
    %8 = arith.maximumf %6, %7 : vector<32x512xf32>
    %c0_7 = arith.constant 0 : index
    %c0_8 = arith.constant 0 : index
    %c0_9 = arith.constant 0 : index
    %9 = vector.load %arg5[%c0_7, %c0_8, %c0_9] : memref<1x32x512xf32, #tpu.memory_space<vmem>>, vector<1x32x512xf32>
    %10 = vector.shape_cast %9 : vector<1x32x512xf32> to vector<32x512xf32>
    %11 = vector.shape_cast %8 : vector<32x512xf32> to vector<1x32x512xf32>
    tpu.vector_store %arg5[%c0_7, %c0_8, %c0_9], %11 {strides = array<i32>} : memref<1x32x512xf32, #tpu.memory_space<vmem>>, vector<1x32x512xf32>,
    return
  }
  func.func @transform_0(%arg0: i32, %arg1: i32) -> (i32, i32, i32) {
    %c0_i32 = arith.constant 0 : i32
    %c0_i32_0 = arith.constant 0 : i32
    return %arg0, %arg1, %c0_i32 : i32, i32, i32
  }
  func.func @transform_1(%arg0: i32, %arg1: i32) -> (i32, i32) {
    %c0_i32 = arith.constant 0 : i32
    %c0_i32_0 = arith.constant 0 : i32
    %c0_i32_1 = arith.constant 0 : i32
    return %c0_i32, %c0_i32_0 : i32, i32
  }
  func.func @transform_2(%arg0: i32, %arg1: i32) -> (i32, i32) {
    %c0_i32 = arith.constant 0 : i32
    %c0_i32_0 = arith.constant 0 : i32
    %c0_i32_1 = arith.constant 0 : i32
    return %c0_i32, %c0_i32_0 : i32, i32
  }
  func.func @transform_3(%arg0: i32, %arg1: i32) -> (i32, i32, i32) {
    %c0_i32 = arith.constant 0 : i32
    %c0_i32_0 = arith.constant 0 : i32
    return %arg0, %arg1, %c0_i32 : i32, i32, i32
  }
}

</mosaic_0001>

<bundles_post_ra>
// kernel: tpu_custom_call.1
= control target key start
LH: loop header
LB: loop body
LE: loop exit
PB: predicated region body
PF: predicated region fallthrough
CT: control target
= control target key end

     0   :  { %8 = vsyncpa [#allocation3], 0  ;;  %s2322_s0 = inlined_call_operand.hbm [shape: bf16[1,96,512], index: 0, kind: input, shape index: {}]   ;;  %s2323_s1 = inlined_call_operand.hbm [shape: bf16[512,512], index: 1, kind: input, shape index: {}]   ;;  %s2324_s2 = inlined_call_operand.vmem [shape: f32[1,512], index: 2, kind: input, shape index: {}]   ;;  %s2325_s3 = inlined_call_operand.hbm [shape: f32[1,96,512], index: 3, kind: output, shape index: {}]  }
   0x1   :  { %10 = vsyncpa [#allocation3 + $0x1], 0 }
   0x2   :  { %11 = vsyncpa [#allocation6], 0 }
   0x3   :  { %12 = vsyncpa [#allocation4], 0 }
   0x4   :  { %14 = vsyncpa [#allocation4 + $0x1], 0  ;;  %s2066_s12 = smov 0   ;;  %s2068_s13 = smov 0  }
   0x5   :  { %s2070_s14 = smov 0   ;;  %s2072_s15 = smov 0  }
   0x6   :  { %s2074_s16 = smov 0   ;;  %s2076_s17 = smov 0  }
   0x7 LB: > { %s1421_s18 = sadd.s32 4294967295, %s2037_s17   ;;  %s1422_s19 = sadd.s32 4294967294, %s2037_s17   ;;  %s2037_s17 = sphi %s2076_s17, %s20_s17   ;;  %s2033_s16 = sphi %s2074_s16, %s2348_s16   ;;  %s2029_s15 = sphi %s2072_s15, %s2347_s15   ;;  %s2025_s14 = sphi %s2070_s14, %s2346_s14   ;;  %s2021_s13 = sphi %s2068_s13, %s2345_s13   ;;  %s2017_s12 = sphi %s2066_s12, %s2344_s12  }
   0x8   : > { %p54_p0 = scmp.ne.s32.totalorder %s2021_s13, %s2017_s12  ;;  %p2100_p1 = scmp.eq.s32.totalorder %s1421_s18, 0 }
   0x9   : > { %p2104_p2 = scmp.eq.s32.totalorder %s1421_s18, 2  ;;  %p128_p3 = scmp.eq.s32.totalorder %s1422_s19, 2 }
   0xa   : > { %s2330_s20 = scalar_select %p2100_p1, 1, 0 }
   0xb   : > { %s2331_s21 = scalar_select %p2104_p2, 1, 0 }
   0xc   : > { %p2110_p4 = por %p2100_p1, %p54_p0  ;;  %p1423_p5 = scmp.ge.s32.totalorder %s2037_s17, 1 }
   0xd   : > { %p2115_p6 = por %p128_p3, %p54_p0  ;;  %p135_p7 = scmp.lt.s32.totalorder %s2037_s17, 4 }
   0xe   : > { %s2332_s22 = scalar_select %p2110_p4, 1, 0 }
   0xf   : > { %s2333_s23 = scalar_select %p2115_p6, 1, 0 }
  0x10   : > { %p2120_p8 = pnand %p1423_p5, %p135_p7  ;;  %s2039_s25 = smov [#allocation5]  }
  0x11   : > { %s147_s26 = sshll.u32 %s2039_s25, 4  ;;  %s29_s28 = sadd.s32 1, %s2033_s16  ;;  %s148_s26 = int_to_ptr.vmem [resolvable:$true] %s147_s26 }
  0x12   : > { %s2334_s24 = scalar_select %p2120_p8, 1, 0 }
  0x13   : > { %p1620_p9 = pneg %p2120_p8  ;;  %s1893_s4 = scalar_lea.hbm %s2323_s1, 16384 }
  0x14   : > { %p1894_p11 = scmp.ne.s32.totalorder %s2323_s1, %s1893_s4  ;;  %p1900_p3 = scmp.lt.u32.totalorder %s1893_s4, %s2323_s1 }
  0x15   : > { %p2128_p10 = pnand %p1620_p9, %p2100_p1 }
  0x17   : > { %p1895_p12 = pneg %p2128_p10 }
  0x19   : > { %p1896_p13 = pnand %p1895_p12, %p1894_p11 }
  0x1b   : > { %p1897_p0 = pneg %p1896_p13 }
  0x1d   : > { %p1902_p5 = pnand %p1900_p3, %p1897_p0 }
  0x1f   : > { %1905 = shalt.err (!%p1902_p5)
}
  0x20   : > { %s1906_s9 = scalar_lea.vmem %s148_s26, 16384  ;;  %p1914_p1 = scmp.lt.s32.totalorder %s148_s26, %s148_s26 }
  0x21   : > { %p1907_p7 = scmp.ne.s32.totalorder %s148_s26, %s1906_s9  ;;  %p1915_p4 = scmp.lt.s32.totalorder %s1906_s9, %s1906_s9 }
  0x23   : > { %p1909_p9 = pnand %p1907_p7, %p1895_p12  ;;  %p1916_p8 = por %p1915_p4, %p1914_p1 }
  0x25   : > { %p1910_p6 = pneg %p1909_p9 }
  0x27   : > { %p1917_p2 = pnand %p1916_p8, %p1910_p6 }
  0x29   : > { %1920 = shalt.err (!%p1917_p2)
}
  0x2a   : > { %s2040_s10 = smov 256   ;;  %s2041_s11 = smov 16  }
  0x2b   : > { %1623 = dma.hbm_to_vmem [thread:$0]  (!%p2128_p10), %s2323_s1, 16384, %s148_s26, [#allocation6], %s2040_s10, %s2040_s10, %s2041_s11  }
  0x2c   : > { %p30_p1 = scmp.ge.s32.totalorder %s29_s28, 3  ;;  %s41_s25 = sadd.s32 1, %s2025_s14 }
  0x2d   : > { %p48_p2 = scmp.ne.s32.totalorder %s2025_s14, %s2021_s13  ;;  %p49_p4 = scmp.eq.s32.totalorder %s2037_s17, 0 }
  0x2e   : > { %s2350_s28 = smov (%p30_p1, %s29_s28), 0  ;;  %p2337_p8 = scmp.ne.s32.totalorder %s2331_s21, 0 }
  0x2f   : > { %p2158_p6 = por %p49_p4, %p48_p2  ;;  %s37_s30 = ssub.s32 %s2033_s16, %s2350_s28 }
  0x30   : > { %p2164_p11 = por %p2337_p8, %p48_p2  ;;  %p1633_p12 = scmp.lt.s32.totalorder %s2037_s17, 3 }
  0x31   : > { %p39_p10 = scmp.eq.s32.totalorder %s37_s30, 0  ;;  %s164_s26 = sand.u32 1, %s2025_s14  }
  0x32   : > { %s1426_s4 = sshll.u32 %s164_s26, 6  ;;  %s1577_s6 = sshll.u32 %s2033_s16, 10 }
  0x33   : > { %s2173_s5 = scalar_select %p39_p10, %s2025_s14, %s41_s25  }
  0x34   : > { %s2179_s9 = scalar_lea.hbm %s2322_s0, %s1577_s6  ;;  %s168_s21 = scalar_lea.vmem [#allocation2], %s1426_s4 }
  0x35   : > { %s178_s18 = sshll.u32 %s168_s21, 4  ;;  %p2185_p13 = pnand %p1633_p12, %p2158_p6  ;;  %s2181_s18 = int_to_ptr.vmem [resolvable:$true] %s178_s18 }
  0x36   : > { %s2189_s25 = scalar_lea.sflag [#allocation3], %s164_s26  ;;  %s1921_s30 = scalar_lea.hbm %s2179_s9, 1024 }
  0x37   : > { %p1922_p0 = scmp.ne.s32.totalorder %s2179_s9, %s1921_s30  ;;  %p1923_p3 = pneg %p2185_p13 }
  0x38   : > { %s1926_s29 = scalar_lea.hbm %s2322_s0, 3072  ;;  %p1927_p9 = scmp.lt.u32.totalorder %s2179_s9, %s2322_s0 }
  0x39   : > { %p1924_p5 = pnand %p1923_p3, %p1922_p0  ;;  %p1928_p1 = scmp.lt.u32.totalorder %s1926_s29, %s1921_s30 }
  0x3a   : > { %p1930_p4 = scmp.lt.u32.totalorder %s1921_s30, %s2179_s9 }
  0x3b   : > { %p1925_p7 = pneg %p1924_p5  ;;  %p1929_p2 = por %p1928_p1, %p1927_p9 }
  0x3d   : > { %p1931_p6 = por %p1930_p4, %p1929_p2 }
  0x3f   : > { %p1932_p8 = pnand %p1931_p6, %p1925_p7 }
  0x41   : > { %1935 = shalt.err (!%p1932_p8)
}
  0x42   : > { %s1936_s26 = scalar_lea.vmem %s2181_s18, 1024  ;;  %s2042_s21 = smov [#allocation2]  }
  0x43   : > { %p1937_p12 = scmp.ne.s32.totalorder %s2181_s18, %s1936_s26  ;;  %s1941_s4 = sshll.u32 %s2042_s21, 4  ;;  %s1942_s4 = int_to_ptr.vmem [resolvable:$false] %s1941_s4 }
  0x44   : > { %s1943_s6 = scalar_lea.vmem %s1942_s4, 2048  ;;  %p1944_p5 = scmp.lt.s32.totalorder %s2181_s18, %s1942_s4 }
  0x45   : > { %p1939_p10 = pnand %p1937_p12, %p1923_p3  ;;  %p1945_p9 = scmp.lt.s32.totalorder %s1943_s6, %s1936_s26 }
  0x47   : > { %p1940_p0 = pneg %p1939_p10  ;;  %p1946_p1 = por %p1945_p9, %p1944_p5 }
  0x49   : > { %p1947_p2 = pnand %p1946_p1, %p1940_p0 }
  0x4b   : > { %1950 = shalt.err (!%p1947_p2)
}
  0x4c   : > { %1627 = dma.hbm_to_vmem [thread:$0]  (!%p2185_p13), %s2179_s9, 1024, %s2181_s18, %s2189_s25, %s2040_s10, %s2040_s10, %s2041_s11  }
  0x4d   : > { %p2340_p3 = scmp.ne.s32.totalorder %s2334_s24, 0 }
  0x4e   : > { %s2223_s30 = sand.u32 (!%p2340_p3), 1, %s2021_s13   ;;  %p2341_p7 = scmp.ne.s32.totalorder (!%p2340_p3), %s2332_s22, 0 }
  0x4f   : > { %190 = sbr.rel (%p2340_p3) target bundleno = 461 (0x1cd), region = 32  ;;  %s1431_s29 = sshll.u32 (!%p2340_p3), %s2223_s30, 6 }
  0x50   : > { %s193_s7 = scalar_lea.sflag (!%p2340_p3), [#allocation3], %s2223_s30  ;;  %s2227_s8 = scalar_lea.vmem (!%p2340_p3), [#allocation2], %s1431_s29 }
  0x56   : > { %2004 = dma.done.wait (%p2341_p7), %s193_s7, 1024  }
  0x57   : > { %2006 = vsyncadd (%p2341_p7), %s193_s7, 4294966272  ;;  %p2342_p13 = scmp.ne.s32.totalorder %s2330_s20, 0 }
  0x59   : > { %2008 = dma.done.wait (%p2342_p13), [#allocation6], 16384  }
  0x5a   : > { %2010 = vsyncadd (%p2342_p13), [#allocation6], 4294950912  ;;  %v1689_v0 = vld [vmem:[#allocation5 + $0x4] ss:$16 sps:$4 sm:$0xff]   ;;  %v1691_v1 = vld [vmem:[#allocation5 + $0xc] ss:$16 sps:$4 sm:$0xff]  }
  0x5b   : > { %1063 = vmatprep.subr.bf16.mxu0 %v1689_v0  ;;  %v1693_v2 = vld [vmem:[#allocation5] ss:$16 sps:$4 sm:$0xff]   ;;  %v1694_v3 = vld [vmem:[#allocation5 + $0x8] ss:$16 sps:$4 sm:$0xff]   ;;  %1169 = vmatprep.subr.bf16.mxu1 %v1691_v1  ;;  %v1695_v4 = vld [vmem:[#allocation5 + $0x24] ss:$16 sps:$4 sm:$0xff]  }
  0x5c   : > { %1064 = vmatpush1.bf16.msra.mxu0 %v1693_v2  ;;  %1170 = vmatpush1.bf16.msra.mxu1 %v1694_v3  ;;  %v1697_v5 = vld [vmem:[#allocation5 + $0x2c] ss:$16 sps:$4 sm:$0xff]   ;;  %v1699_v6 = vld [vmem:[#allocation5 + $0x20] ss:$16 sps:$4 sm:$0xff]   ;;  %v1700_v7 = vld [vmem:[#allocation5 + $0x28] ss:$16 sps:$4 sm:$0xff]  }
  0x5d   : > { %1065 = vmatprep.subr.bf16.mxu0 %v1695_v4  ;;  %1171 = vmatprep.subr.bf16.mxu1 %v1697_v5  ;;  %v1701_v8 = vld [vmem:[#allocation5 + $0x44] ss:$16 sps:$4 sm:$0xff]   ;;  %v1703_v9 = vld [vmem:[#allocation5 + $0x4c] ss:$16 sps:$4 sm:$0xff]   ;;  %v1705_v10 = vld [vmem:[#allocation5 + $0x40] ss:$16 sps:$4 sm:$0xff]  }
  0x5e   : > { %v1706_v11 = vld [vmem:[#allocation5 + $0x48] ss:$16 sps:$4 sm:$0xff]   ;;  %v1707_v12 = vld [vmem:[#allocation5 + $0x64] ss:$16 sps:$4 sm:$0xff]   ;;  %v1709_v13 = vld [vmem:[#allocation5 + $0x6c] ss:$16 sps:$4 sm:$0xff]  }
  0x5f   : > { %v1711_v14 = vld [vmem:[#allocation5 + $0x60] ss:$16 sps:$4 sm:$0xff]   ;;  %v1712_v15 = vld [vmem:[#allocation5 + $0x68] ss:$16 sps:$4 sm:$0xff]   ;;  %v1713_v16 = vld [vmem:[#allocation5 + $0x84] ss:$16 sps:$4 sm:$0xff]  }
  0x60   : > { %1066 = vmatpush1.bf16.msra.mxu0 %v1699_v6  ;;  %1172 = vmatpush1.bf16.msra.mxu1 %v1700_v7  ;;  %v1715_v17 = vld [vmem:[#allocation5 + $0x8c] ss:$16 sps:$4 sm:$0xff]   ;;  %v1717_v18 = vld [vmem:[#allocation5 + $0x80] ss:$16 sps:$4 sm:$0xff]   ;;  %v1718_v19 = vld [vmem:[#allocation5 + $0x88] ss:$16 sps:$4 sm:$0xff]  }
  0x61   : > { %1067 = vmatprep.subr.bf16.mxu0 %v1701_v8  ;;  %1173 = vmatprep.subr.bf16.mxu1 %v1703_v9  ;;  %v1719_v20 = vld [vmem:[#allocation5 + $0xa4] ss:$16 sps:$4 sm:$0xff]   ;;  %v1721_v21 = vld [vmem:[#allocation5 + $0xac] ss:$16 sps:$4 sm:$0xff]   ;;  %v1723_v22 = vld [vmem:[#allocation5 + $0xa0] ss:$16 sps:$4 sm:$0xff]  }
  0x62   : > { %v1724_v23 = vld [vmem:[#allocation5 + $0xa8] ss:$16 sps:$4 sm:$0xff]   ;;  %v1725_v24 = vld [vmem:[#allocation5 + $0xc4] ss:$16 sps:$4 sm:$0xff]   ;;  %v1727_v25 = vld [vmem:[#allocation5 + $0xcc] ss:$16 sps:$4 sm:$0xff]  }
  0x63   : > { %v1729_v26 = vld [vmem:[#allocation5 + $0xc0] ss:$16 sps:$4 sm:$0xff]   ;;  %v1730_v27 = vld [vmem:[#allocation5 + $0xc8] ss:$16 sps:$4 sm:$0xff]   ;;  %v1731_v28 = vld [vmem:[#allocation5 + $0xe4] ss:$16 sps:$4 sm:$0xff]  }
  0x64   : > { %1068 = vmatpush1.bf16.msra.mxu0 %v1705_v10  ;;  %1174 = vmatpush1.bf16.msra.mxu1 %v1706_v11  ;;  %v1733_v29 = vld [vmem:[#allocation5 + $0xec] ss:$16 sps:$4 sm:$0xff]   ;;  %v1735_v30 = vld [vmem:[#allocation5 + $0xe0] ss:$16 sps:$4 sm:$0xff]   ;;  %v1736_v31 = vld [vmem:[#allocation5 + $0xe8] ss:$16 sps:$4 sm:$0xff]  }
  0x65   : > { %1069 = vmatprep.subr.bf16.mxu0 %v1707_v12  ;;  %1175 = vmatprep.subr.bf16.mxu1 %v1709_v13  ;;  %v1737_v32 = vld [vmem:[#allocation5 + $0x104] ss:$16 sps:$4 sm:$0xff]   ;;  %v1739_v33 = vld [vmem:[#allocation5 + $0x10c] ss:$16 sps:$4 sm:$0xff]   ;;  %v1741_v34 = vld [vmem:[#allocation5 + $0x100] ss:$16 sps:$4 sm:$0xff]  }
  0x66   : > { %v1742_v35 = vld [vmem:[#allocation5 + $0x108] ss:$16 sps:$4 sm:$0xff]   ;;  %v1743_v36 = vld [vmem:[#allocation5 + $0x124] ss:$16 sps:$4 sm:$0xff]   ;;  %v1745_v37 = vld [vmem:[#allocation5 + $0x12c] ss:$16 sps:$4 sm:$0xff]  }
  0x67   : > { %v1747_v38 = vld [vmem:[#allocation5 + $0x120] ss:$16 sps:$4 sm:$0xff]   ;;  %v1748_v39 = vld [vmem:[#allocation5 + $0x128] ss:$16 sps:$4 sm:$0xff]   ;;  %v1749_v40 = vld [vmem:[#allocation5 + $0x144] ss:$16 sps:$4 sm:$0xff]  }
  0x68   : > { %1070 = vmatpush1.bf16.msra.mxu0 %v1711_v14  ;;  %1176 = vmatpush1.bf16.msra.mxu1 %v1712_v15  ;;  %v1751_v41 = vld [vmem:[#allocation5 + $0x14c] ss:$16 sps:$4 sm:$0xff]   ;;  %v1753_v42 = vld [vmem:[#allocation5 + $0x140] ss:$16 sps:$4 sm:$0xff]   ;;  %v1754_v43 = vld [vmem:[#allocation5 + $0x148] ss:$16 sps:$4 sm:$0xff]  }
  0x69   : > { %1071 = vmatprep.subr.bf16.mxu0 %v1713_v16  ;;  %1177 = vmatprep.subr.bf16.mxu1 %v1715_v17  ;;  %v1755_v44 = vld [vmem:[#allocation5 + $0x164] ss:$16 sps:$4 sm:$0xff]   ;;  %v1757_v45 = vld [vmem:[#allocation5 + $0x16c] ss:$16 sps:$4 sm:$0xff]   ;;  %v1759_v46 = vld [vmem:[#allocation5 + $0x160] ss:$16 sps:$4 sm:$0xff]  }
  0x6a   : > { %v1760_v47 = vld [vmem:[#allocation5 + $0x168] ss:$16 sps:$4 sm:$0xff]   ;;  %v1787_v48 = vld [vmem:[%s2227_s8 + $0x4] ss:$16 sps:$4 sm:$0xff]   ;;  %v1763_v50 = vld [vmem:[#allocation5 + $0x18c] ss:$16 sps:$4 sm:$0xff]  }
  0x6b   : > { %v1761_v49 = vld [vmem:[#allocation5 + $0x184] ss:$16 sps:$4 sm:$0xff]   ;;  %1095 = vmatprep.mubr.bf16.mxu0 %v1787_v48  ;;  %1201 = vmatprep.mubr.bf16.mxu1 %v1787_v48  ;;  %v1765_v51 = vld [vmem:[#allocation5 + $0x180] ss:$16 sps:$4 sm:$0xff]   ;;  %v1766_v52 = vld [vmem:[#allocation5 + $0x188] ss:$16 sps:$4 sm:$0xff]  }
  0x6c   : > { %1072 = vmatpush1.bf16.msra.mxu0 %v1717_v18  ;;  %1178 = vmatpush1.bf16.msra.mxu1 %v1718_v19  ;;  %v1767_v53 = vld [vmem:[#allocation5 + $0x1a4] ss:$16 sps:$4 sm:$0xff]   ;;  %v1769_v54 = vld [vmem:[#allocation5 + $0x1ac] ss:$16 sps:$4 sm:$0xff]   ;;  %v1771_v55 = vld [vmem:[#allocation5 + $0x1a0] ss:$16 sps:$4 sm:$0xff]  }
  0x6d   : > { %1073 = vmatprep.subr.bf16.mxu0 %v1719_v20  ;;  %1179 = vmatprep.subr.bf16.mxu1 %v1721_v21  ;;  %v1772_v56 = vld [vmem:[#allocation5 + $0x1a8] ss:$16 sps:$4 sm:$0xff]   ;;  %v1773_v57 = vld [vmem:[#allocation5 + $0x1c4] ss:$16 sps:$4 sm:$0xff]   ;;  %v1775_v58 = vld [vmem:[#allocation5 + $0x1cc] ss:$16 sps:$4 sm:$0xff]  }
  0x6e   : > { %v1777_v59 = vld [vmem:[#allocation5 + $0x1c0] ss:$16 sps:$4 sm:$0xff]   ;;  %v1778_v60 = vld [vmem:[#allocation5 + $0x1c8] ss:$16 sps:$4 sm:$0xff]   ;;  %v1779_v61 = vld [vmem:[#allocation5 + $0x1e4] ss:$16 sps:$4 sm:$0xff]  }
  0x6f   : > { %v1781_v62 = vld [vmem:[#allocation5 + $0x1ec] ss:$16 sps:$4 sm:$0xff]   ;;  %v1783_v63 = vld [vmem:[#allocation5 + $0x1e0] ss:$16 sps:$4 sm:$0xff]   ;;  %v1784_v0 = vld [vmem:[#allocation5 + $0x1e8] ss:$16 sps:$4 sm:$0xff]  }
  0x70   : > { %1074 = vmatpush1.bf16.msra.mxu0 %v1723_v22  ;;  %1180 = vmatpush1.bf16.msra.mxu1 %v1724_v23  ;;  %v1790_v1 = vld [vmem:[#allocation5 + $0x204] ss:$16 sps:$4 sm:$0xff]   ;;  %v1793_v2 = vld [vmem:[#allocation5 + $0x20c] ss:$16 sps:$4 sm:$0xff]   ;;  %v1785_v3 = vld [vmem:[%s2227_s8] ss:$16 sps:$4 sm:$0xff]  }
  0x71   : > { %1075 = vmatprep.subr.bf16.mxu0 %v1725_v24  ;;  %1181 = vmatprep.subr.bf16.mxu1 %v1727_v25  ;;  %v1788_v4 = vld [vmem:[#allocation5 + $0x200] ss:$16 sps:$4 sm:$0xff]   ;;  %v1791_v5 = vld [vmem:[#allocation5 + $0x208] ss:$16 sps:$4 sm:$0xff]   ;;  %v1796_v6 = vld [vmem:[#allocation5 + $0x224] ss:$16 sps:$4 sm:$0xff]  }
  0x72   : > { %v1799_v7 = vld [vmem:[#allocation5 + $0x22c] ss:$16 sps:$4 sm:$0xff]   ;;  %v1794_v8 = vld [vmem:[#allocation5 + $0x220] ss:$16 sps:$4 sm:$0xff]   ;;  %v1797_v9 = vld [vmem:[#allocation5 + $0x228] ss:$16 sps:$4 sm:$0xff]  }
  0x73   : > { %v1802_v10 = vld [vmem:[#allocation5 + $0x244] ss:$16 sps:$4 sm:$0xff]   ;;  %v1805_v11 = vld [vmem:[#allocation5 + $0x24c] ss:$16 sps:$4 sm:$0xff]   ;;  %v1800_v12 = vld [vmem:[#allocation5 + $0x240] ss:$16 sps:$4 sm:$0xff]  }
  0x74   : > { %1076 = vmatpush1.bf16.msra.mxu0 %v1729_v26  ;;  %1182 = vmatpush1.bf16.msra.mxu1 %v1730_v27  ;;  %v1803_v13 = vld [vmem:[#allocation5 + $0x248] ss:$16 sps:$4 sm:$0xff]   ;;  %v1808_v14 = vld [vmem:[#allocation5 + $0x264] ss:$16 sps:$4 sm:$0xff]   ;;  %v1811_v15 = vld [vmem:[#allocation5 + $0x26c] ss:$16 sps:$4 sm:$0xff]  }
  0x75   : > { %1077 = vmatprep.subr.bf16.mxu0 %v1731_v28  ;;  %1183 = vmatprep.subr.bf16.mxu1 %v1733_v29  ;;  %v1806_v16 = vld [vmem:[#allocation5 + $0x260] ss:$16 sps:$4 sm:$0xff]   ;;  %v1809_v17 = vld [vmem:[#allocation5 + $0x268] ss:$16 sps:$4 sm:$0xff]   ;;  %v1814_v18 = vld [vmem:[#allocation5 + $0x284] ss:$16 sps:$4 sm:$0xff]  }
  0x76   : > { %v1817_v19 = vld [vmem:[#allocation5 + $0x28c] ss:$16 sps:$4 sm:$0xff]   ;;  %v1812_v20 = vld [vmem:[#allocation5 + $0x280] ss:$16 sps:$4 sm:$0xff]   ;;  %v1815_v21 = vld [vmem:[#allocation5 + $0x288] ss:$16 sps:$4 sm:$0xff]  }
  0x77   : > { %v1820_v22 = vld [vmem:[#allocation5 + $0x2a4] ss:$16 sps:$4 sm:$0xff]   ;;  %v1823_v23 = vld [vmem:[#allocation5 + $0x2ac] ss:$16 sps:$4 sm:$0xff]   ;;  %v1818_v24 = vld [vmem:[#allocation5 + $0x2a0] ss:$16 sps:$4 sm:$0xff]  }
  0x78   : > { %1078 = vmatpush1.bf16.msra.mxu0 %v1735_v30  ;;  %1184 = vmatpush1.bf16.msra.mxu1 %v1736_v31  ;;  %v1872_v25 = vld [vmem:[%s2227_s8 + $0x24] ss:$16 sps:$4 sm:$0xff]   ;;  %v1821_v26 = vld [vmem:[#allocation5 + $0x2a8] ss:$16 sps:$4 sm:$0xff]   ;;  %v1874_v27 = vld [vmem:[%s2227_s8 + $0x20] ss:$16 sps:$4 sm:$0xff]  }
  0x79   : > { %1079 = vmatprep.subr.bf16.mxu0 %v1737_v32  ;;  %1185 = vmatprep.subr.bf16.mxu1 %v1739_v33  ;;  %v1826_v28 = vld [vmem:[#allocation5 + $0x2c4] ss:$16 sps:$4 sm:$0xff]   ;;  %v1829_v29 = vld [vmem:[#allocation5 + $0x2cc] ss:$16 sps:$4 sm:$0xff]   ;;  %v1824_v30 = vld [vmem:[#allocation5 + $0x2c0] ss:$16 sps:$4 sm:$0xff]  }
  0x7a   : > { %v1827_v31 = vld [vmem:[#allocation5 + $0x2c8] ss:$16 sps:$4 sm:$0xff]   ;;  %v1832_v32 = vld [vmem:[#allocation5 + $0x2e4] ss:$16 sps:$4 sm:$0xff]   ;;  %v1835_v33 = vld [vmem:[#allocation5 + $0x2ec] ss:$16 sps:$4 sm:$0xff]  }
  0x7b   : > { %v1851_v48 = vld [vmem:[#allocation5 + $0x348] ss:$16 sps:$4 sm:$0xff]   ;;  %s1433_s24 = sshll.u32 %s2223_s30, 7  ;;  %s1579_s11 = sshll.u32 %s2029_s15, 11 }
  0x7c   : > { %1080 = vmatpush1.bf16.msra.mxu0 %v1741_v34  ;;  %1186 = vmatpush1.bf16.msra.mxu1 %v1742_v35  ;;  %v1889_v34 = vld [vmem:[%s2227_s8 + $0xc] ss:$16 sps:$4 sm:$0xff]   ;;  %v1830_v35 = vld [vmem:[#allocation5 + $0x2e0] ss:$16 sps:$4 sm:$0xff]   ;;  %s2249_s10 = scalar_lea.vmem [#allocation7], %s1433_s24  ;;  %s2266_s19 = scalar_lea.hbm %s2325_s3, %s1579_s11 }
  0x7d   : > { %1081 = vmatprep.subr.bf16.mxu0 %v1743_v36  ;;  %1187 = vmatprep.subr.bf16.mxu1 %v1745_v37  ;;  %v1833_v36 = vld [vmem:[#allocation5 + $0x2e8] ss:$16 sps:$4 sm:$0xff]   ;;  %v1838_v37 = vld [vmem:[#allocation5 + $0x304] ss:$16 sps:$4 sm:$0xff]   ;;  %s1324_s9 = sshll.u32 %s2249_s10, 4  ;;  %s1308_s25 = scalar_lea.sflag [#allocation4], %s2223_s30  ;;  %s2268_s9 = int_to_ptr.vmem [resolvable:$true] %s1324_s9 }
  0x7e   : > { %s1951_s26 = scalar_lea.vmem %s2268_s9, 2048  ;;  %s2043_s21 = smov [#allocation7]  }
  0x7f   : > { %p1952_p4 = scmp.ne.s32.totalorder %s2268_s9, %s1951_s26  ;;  %s1955_s4 = sshll.u32 %s2043_s21, 4  ;;  %s1956_s4 = int_to_ptr.vmem [resolvable:$false] %s1955_s4 }
  0x80   : > { %1082 = vmatpush1.bf16.msra.mxu0 %v1747_v38  ;;  %1188 = vmatpush1.bf16.msra.mxu1 %v1748_v39  ;;  %v1841_v38 = vld [vmem:[#allocation5 + $0x30c] ss:$16 sps:$4 sm:$0xff]   ;;  %v1836_v39 = vld [vmem:[#allocation5 + $0x300] ss:$16 sps:$4 sm:$0xff]   ;;  %s1957_s6 = scalar_lea.vmem %s1956_s4, 4096  ;;  %p1958_p12 = scmp.lt.s32.totalorder %s2268_s9, %s1956_s4 }
  0x81   : > { %1083 = vmatprep.subr.bf16.mxu0 %v1749_v40  ;;  %1189 = vmatprep.subr.bf16.mxu1 %v1751_v41  ;;  %v1839_v40 = vld [vmem:[#allocation5 + $0x308] ss:$16 sps:$4 sm:$0xff]   ;;  %v1844_v41 = vld [vmem:[#allocation5 + $0x324] ss:$16 sps:$4 sm:$0xff]   ;;  %p1953_p6 = pnand %p1952_p4, %p2164_p11  ;;  %p1959_p10 = scmp.lt.s32.totalorder %s1957_s6, %s1951_s26 }
  0x83   : > { %p1954_p8 = pneg %p1953_p6  ;;  %p1960_p0 = por %p1959_p10, %p1958_p12 }
  0x84   : > { %1084 = vmatpush1.bf16.msra.mxu0 %v1753_v42  ;;  %1190 = vmatpush1.bf16.msra.mxu1 %v1754_v43  ;;  %v1847_v42 = vld [vmem:[#allocation5 + $0x32c] ss:$16 sps:$4 sm:$0xff]   ;;  %v1842_v43 = vld [vmem:[#allocation5 + $0x320] ss:$16 sps:$4 sm:$0xff]  }
  0x85   : > { %1085 = vmatprep.subr.bf16.mxu0 %v1755_v44  ;;  %1191 = vmatprep.subr.bf16.mxu1 %v1757_v45  ;;  %v1845_v44 = vld [vmem:[#allocation5 + $0x328] ss:$16 sps:$4 sm:$0xff]   ;;  %v1850_v45 = vld [vmem:[#allocation5 + $0x344] ss:$16 sps:$4 sm:$0xff]   ;;  %p1961_p5 = pnand %p1960_p0, %p1954_p8 }
  0x88   : > { %1086 = vmatpush1.bf16.msra.mxu0 %v1759_v46  ;;  %1192 = vmatpush1.bf16.msra.mxu1 %v1760_v47  ;;  %v1853_v46 = vld [vmem:[#allocation5 + $0x34c] ss:$16 sps:$4 sm:$0xff]   ;;  %v1848_v47 = vld [vmem:[#allocation5 + $0x340] ss:$16 sps:$4 sm:$0xff]  }
  0x89   : > { %1087 = vmatprep.subr.bf16.mxu0 %v1761_v49  ;;  %1193 = vmatprep.subr.bf16.mxu1 %v1763_v50  ;;  %v1856_v49 = vld [vmem:[#allocation5 + $0x364] ss:$16 sps:$4 sm:$0xff]   ;;  %v1859_v50 = vld [vmem:[#allocation5 + $0x36c] ss:$16 sps:$4 sm:$0xff]  }
  0x8c   : > { %1088 = vmatpush1.bf16.msra.mxu0 %v1765_v51  ;;  %1194 = vmatpush1.bf16.msra.mxu1 %v1766_v52  ;;  %v1854_v51 = vld [vmem:[#allocation5 + $0x360] ss:$16 sps:$4 sm:$0xff]   ;;  %v1857_v52 = vld [vmem:[#allocation5 + $0x368] ss:$16 sps:$4 sm:$0xff]  }
  0x8d   : > { %1089 = vmatprep.subr.bf16.mxu0 %v1767_v53  ;;  %1195 = vmatprep.subr.bf16.mxu1 %v1769_v54  ;;  %v1862_v53 = vld [vmem:[#allocation5 + $0x384] ss:$16 sps:$4 sm:$0xff]   ;;  %v1865_v54 = vld [vmem:[#allocation5 + $0x38c] ss:$16 sps:$4 sm:$0xff]  }
  0x90   : > { %1090 = vmatpush1.bf16.msra.mxu0 %v1771_v55  ;;  %1196 = vmatpush1.bf16.msra.mxu1 %v1772_v56  ;;  %v1860_v55 = vld [vmem:[#allocation5 + $0x380] ss:$16 sps:$4 sm:$0xff]   ;;  %v1863_v56 = vld [vmem:[#allocation5 + $0x388] ss:$16 sps:$4 sm:$0xff]  }
  0x91   : > { %1091 = vmatprep.subr.bf16.mxu0 %v1773_v57  ;;  %1197 = vmatprep.subr.bf16.mxu1 %v1775_v58  ;;  %v1868_v57 = vld [vmem:[#allocation5 + $0x3a4] ss:$16 sps:$4 sm:$0xff]   ;;  %v1871_v58 = vld [vmem:[#allocation5 + $0x3ac] ss:$16 sps:$4 sm:$0xff]  }
  0x94   : > { %1092 = vmatpush1.bf16.msra.mxu0 %v1777_v59  ;;  %1198 = vmatpush1.bf16.msra.mxu1 %v1778_v60  ;;  %v1866_v59 = vld [vmem:[#allocation5 + $0x3a0] ss:$16 sps:$4 sm:$0xff]   ;;  %v1869_v60 = vld [vmem:[#allocation5 + $0x3a8] ss:$16 sps:$4 sm:$0xff]  }
  0x95   : > { %1093 = vmatprep.subr.bf16.mxu0 %v1779_v61  ;;  %1199 = vmatprep.subr.bf16.mxu1 %v1781_v62  ;;  %v1877_v61 = vld [vmem:[#allocation5 + $0x3c4] ss:$16 sps:$4 sm:$0xff]   ;;  %v1880_v62 = vld [vmem:[#allocation5 + $0x3cc] ss:$16 sps:$4 sm:$0xff]  }
  0x98   : > { %1094 = vmatpush1.bf16.msra.mxu0 %v1783_v63  ;;  %1200 = vmatpush1.bf16.msra.mxu1 %v1784_v0  ;;  %v1875_v63 = vld [vmem:[#allocation5 + $0x3c0] ss:$16 sps:$4 sm:$0xff]   ;;  %v1878_v0 = vld [vmem:[#allocation5 + $0x3c8] ss:$16 sps:$4 sm:$0xff]  }
  0x99   : > { %1116 = vmatprep.subr.bf16.mxu0 %v1790_v1  ;;  %1222 = vmatprep.subr.bf16.mxu1 %v1793_v2  ;;  %v1883_v1 = vld [vmem:[#allocation5 + $0x3e4] ss:$16 sps:$4 sm:$0xff]   ;;  %v1886_v2 = vld [vmem:[#allocation5 + $0x3ec] ss:$16 sps:$4 sm:$0xff]  }
  0x9b   : > { %1096 = vmatmul.mubr.bf16.vlgmr.msra.gmra.mrb[0].mxu0 %v1785_v3  ;;  %1202 = vmatmul.mubr.bf16.vlgmr.msra.gmra.mrb[0].mxu1 %v1785_v3  ;;  %v1881_v3 = vld [vmem:[#allocation5 + $0x3e0] ss:$16 sps:$4 sm:$0xff]  }
  0x9c   : > { %1117 = vmatpush1.bf16.msra.mxu0 %v1788_v4  ;;  %1223 = vmatpush1.bf16.msra.mxu1 %v1791_v5  ;;  %v1884_v4 = vld [vmem:[#allocation5 + $0x3e8] ss:$16 sps:$4 sm:$0xff]  }
  0x9d   : > { %1118 = vmatprep.subr.bf16.mxu0 %v1796_v6  ;;  %1224 = vmatprep.subr.bf16.mxu1 %v1799_v7  ;;  %v1887_v5 = vld [vmem:[%s2227_s8 + $0x8] ss:$16 sps:$4 sm:$0xff]   ;;  %v1890_v6 = vld [vmem:[%s2227_s8 + $0x2c] ss:$16 sps:$4 sm:$0xff]  }
  0x9e   : > { %1105 = vmatprep.mubr.bf16.mxu0 %v1872_v25  ;;  %1211 = vmatprep.mubr.bf16.mxu1 %v1872_v25  ;;  %v1892_v7 = vld [vmem:[%s2227_s8 + $0x28] ss:$16 sps:$4 sm:$0xff]  }
  0xa0   : > { %1119 = vmatpush1.bf16.msra.mxu0 %v1794_v8  ;;  %1225 = vmatpush1.bf16.msra.mxu1 %v1797_v9  ;;  %v363_v8 = vlaneseq }
  0xa1   : > { %1120 = vmatprep.subr.bf16.mxu0 %v1802_v10  ;;  %1226 = vmatprep.subr.bf16.mxu1 %v1805_v11 }
  0xa2   : > { %v364_v9 = vshrl.u32 %v363_v8, 7 }
  0xa3   : > { %1106 = vmatmul.mubr.bf16.gmra.mrb[4].mxu0 %v1874_v27  ;;  %1212 = vmatmul.mubr.bf16.gmra.mrb[4].mxu1 %v1874_v27 }
  0xa4   : > { %1121 = vmatpush1.bf16.msra.mxu0 %v1800_v12  ;;  %1227 = vmatpush1.bf16.msra.mxu1 %v1803_v13  ;;  %v365_v10 = vsub.s32 0, %v364_v9  ;;  %v373_v11 = vsub.s32 2, %v364_v9  ;;  %v361_v12 = vld [vmem:[%s2324_s2] sm:$0xf]  ;;  %v369_v13 = vsub.s32 1, %v364_v9 }
  0xa5   : > { %1122 = vmatprep.subr.bf16.mxu0 %v1808_v14  ;;  %1228 = vmatprep.subr.bf16.mxu1 %v1811_v15  ;;  %v377_v14 = vsub.s32 3, %v364_v9 }
  0xa6   : > { %1148 = vmatprep.mubr.bf16.mxu0 %v1889_v34  ;;  %1254 = vmatprep.mubr.bf16.mxu1 %v1889_v34  ;;  %v366_v15 = vrot.slane %v361_v12, %v365_v10 }
  0xa8   : > { %1123 = vmatpush1.bf16.msra.mxu0 %v1806_v16  ;;  %1229 = vmatpush1.bf16.msra.mxu1 %v1809_v17  ;;  %v374_v16 = vrot.slane %v361_v12, %v373_v11  ;;  %v370_v17 = vrot.slane %v361_v12, %v369_v13 }
  0xa9   : > { %1124 = vmatprep.subr.bf16.mxu0 %v1814_v18  ;;  %1230 = vmatprep.subr.bf16.mxu1 %v1817_v19  ;;  %v378_v18 = vrot.slane %v361_v12, %v377_v14 }
  0xac   : > { %1125 = vmatpush1.bf16.msra.mxu0 %v1812_v20  ;;  %1231 = vmatpush1.bf16.msra.mxu1 %v1815_v21 }
  0xad   : > { %1126 = vmatprep.subr.bf16.mxu0 %v1820_v22  ;;  %1232 = vmatprep.subr.bf16.mxu1 %v1823_v23 }
  0xb0   : > { %1127 = vmatpush1.bf16.msra.mxu0 %v1818_v24  ;;  %1233 = vmatpush1.bf16.msra.mxu1 %v1821_v26 }
  0xb1   : > { %1128 = vmatprep.subr.bf16.mxu0 %v1826_v28  ;;  %1234 = vmatprep.subr.bf16.mxu1 %v1829_v29 }
  0xb4   : > { %1129 = vmatpush1.bf16.msra.mxu0 %v1824_v30  ;;  %1235 = vmatpush1.bf16.msra.mxu1 %v1827_v31 }
  0xb5   : > { %1130 = vmatprep.subr.bf16.mxu0 %v1832_v32  ;;  %1236 = vmatprep.subr.bf16.mxu1 %v1835_v33 }
  0xb8   : > { %1131 = vmatpush1.bf16.msra.mxu0 %v1830_v35  ;;  %1237 = vmatpush1.bf16.msra.mxu1 %v1833_v36 }
  0xb9   : > { %1132 = vmatprep.subr.bf16.mxu0 %v1838_v37  ;;  %1238 = vmatprep.subr.bf16.mxu1 %v1841_v38 }
  0xbc   : > { %1133 = vmatpush1.bf16.msra.mxu0 %v1836_v39  ;;  %1239 = vmatpush1.bf16.msra.mxu1 %v1839_v40 }
  0xbd   : > { %1134 = vmatprep.subr.bf16.mxu0 %v1844_v41  ;;  %1240 = vmatprep.subr.bf16.mxu1 %v1847_v42 }
  0xc0   : > { %1135 = vmatpush1.bf16.msra.mxu0 %v1842_v43  ;;  %1241 = vmatpush1.bf16.msra.mxu1 %v1845_v44 }
  0xc1   : > { %1136 = vmatprep.subr.bf16.mxu0 %v1850_v45  ;;  %1242 = vmatprep.subr.bf16.mxu1 %v1853_v46 }
  0xc4   : > { %1137 = vmatpush1.bf16.msra.mxu0 %v1848_v47  ;;  %1243 = vmatpush1.bf16.msra.mxu1 %v1851_v48 }
  0xc5   : > { %1138 = vmatprep.subr.bf16.mxu0 %v1856_v49  ;;  %1244 = vmatprep.subr.bf16.mxu1 %v1859_v50 }
  0xc8   : > { %1139 = vmatpush1.bf16.msra.mxu0 %v1854_v51  ;;  %1245 = vmatpush1.bf16.msra.mxu1 %v1857_v52 }
  0xc9   : > { %1140 = vmatprep.subr.bf16.mxu0 %v1862_v53  ;;  %1246 = vmatprep.subr.bf16.mxu1 %v1865_v54 }
  0xcc   : > { %1141 = vmatpush1.bf16.msra.mxu0 %v1860_v55  ;;  %1247 = vmatpush1.bf16.msra.mxu1 %v1863_v56 }
  0xcd   : > { %1142 = vmatprep.subr.bf16.mxu0 %v1868_v57  ;;  %1248 = vmatprep.subr.bf16.mxu1 %v1871_v58 }
  0xd0   : > { %1143 = vmatpush1.bf16.msra.mxu0 %v1866_v59  ;;  %1249 = vmatpush1.bf16.msra.mxu1 %v1869_v60 }
  0xd1   : > { %1144 = vmatprep.subr.bf16.mxu0 %v1877_v61  ;;  %1250 = vmatprep.subr.bf16.mxu1 %v1880_v62 }
  0xd4   : > { %1145 = vmatpush1.bf16.msra.mxu0 %v1875_v63  ;;  %1251 = vmatpush1.bf16.msra.mxu1 %v1878_v0 }
  0xd5   : > { %1146 = vmatprep.subr.bf16.mxu0 %v1883_v1  ;;  %1252 = vmatprep.subr.bf16.mxu1 %v1886_v2 }
  0xd8   : > { %1147 = vmatpush1.bf16.msra.mxu0 %v1881_v3  ;;  %1253 = vmatpush1.bf16.msra.mxu1 %v1884_v4 }
  0xdb   : > { %1149 = vmatmul.mubr.bf16.vlgmr.msra.gmra.mrb[0].mxu0 %v1887_v5  ;;  %1255 = vmatmul.mubr.bf16.vlgmr.msra.gmra.mrb[0].mxu1 %v1887_v5 }
  0xdc   : > { %1158 = vmatprep.mubr.bf16.mxu0 %v1890_v6  ;;  %1264 = vmatprep.mubr.bf16.mxu1 %v1890_v6 }
  0xe3   : > { %1159 = vmatmul.mubr.bf16.gmra.mrb[4].mxu0 %v1892_v7  ;;  %1265 = vmatmul.mubr.bf16.gmra.mrb[4].mxu1 %v1892_v7 }
 0x1ae   : > { %v1150_v19 = vpop.f32.mrb[0].mxu0  ;;  %v1256_v20 = vpop.f32.mrb[0].mxu1 }
 0x1af   : > { %v1580_v21 = vadd.f32 %v1150_v19, %v366_v15  ;;  %v1588_v22 = vadd.f32 %v1256_v20, %v374_v16  ;;  %v1152_v23 = vpop.f32.mrb[1].mxu0  ;;  %v1258_v24 = vpop.f32.mrb[1].mxu1 }
 0x1b0   : > { %v1581_v25 = vadd.f32 %v1152_v23, %v370_v17  ;;  %v1589_v26 = vadd.f32 %v1258_v24, %v378_v18  ;;  %v1154_v27 = vpop.f32.mrb[2].mxu0  ;;  %v1260_v28 = vpop.f32.mrb[2].mxu1 }
 0x1b1   : > { %v1275_v29 = vmax.f32 %v1580_v21, 0.0  ;;  %v1277_v30 = vmax.f32 %v1588_v22, 0.0  ;;  %v1582_v31 = vadd.f32 %v1154_v27, %v366_v15  ;;  %v1590_v32 = vadd.f32 %v1260_v28, %v374_v16  ;;  %v1156_v33 = vpop.f32.mrb[3].mxu0  ;;  %v1262_v34 = vpop.f32.mrb[3].mxu1 }
 0x1b2   : > { %v1276_v35 = vmax.f32 %v1581_v25, 0.0  ;;  %v1278_v36 = vmax.f32 %v1589_v26, 0.0  ;;  %v1583_v37 = vadd.f32 %v1156_v33, %v370_v17  ;;  %v1591_v38 = vadd.f32 %v1262_v34, %v378_v18 }
 0x1b3   : > { %1291 = vst [vmem:[%s2249_s10] sm:$0xff] %v1275_v29  ;;  %1293 = vst [vmem:[%s2249_s10 + $0x10] sm:$0xff] %v1277_v30  ;;  %v1279_v39 = vmax.f32 %v1582_v31, 0.0  ;;  %v1281_v40 = vmax.f32 %v1590_v32, 0.0 }
 0x1b4   : > { %1292 = vst [vmem:[%s2249_s10 + $0x8] sm:$0xff] %v1276_v35  ;;  %1294 = vst [vmem:[%s2249_s10 + $0x18] sm:$0xff] %v1278_v36  ;;  %v1280_v41 = vmax.f32 %v1583_v37, 0.0  ;;  %v1282_v42 = vmax.f32 %v1591_v38, 0.0 }
 0x1b5   : > { %1295 = vst [vmem:[%s2249_s10 + $0x20] sm:$0xff] %v1279_v39  ;;  %1297 = vst [vmem:[%s2249_s10 + $0x30] sm:$0xff] %v1281_v40 }
 0x1b6   : > { %1296 = vst [vmem:[%s2249_s10 + $0x28] sm:$0xff] %v1280_v41  ;;  %1298 = vst [vmem:[%s2249_s10 + $0x38] sm:$0xff] %v1282_v42  ;;  %v1160_v43 = vpop.f32.mrb[4].mxu0  ;;  %v1266_v44 = vpop.f32.mrb[4].mxu1 }
 0x1b7   : > { %v1584_v45 = vadd.f32 %v1160_v43, %v366_v15  ;;  %v1592_v46 = vadd.f32 %v1266_v44, %v374_v16  ;;  %v1162_v47 = vpop.f32.mrb[5].mxu0  ;;  %v1268_v48 = vpop.f32.mrb[5].mxu1 }
 0x1b8   : > { %v1585_v49 = vadd.f32 %v1162_v47, %v370_v17  ;;  %v1593_v50 = vadd.f32 %v1268_v48, %v378_v18  ;;  %v1164_v51 = vpop.f32.mrb[6].mxu0  ;;  %v1270_v52 = vpop.f32.mrb[6].mxu1 }
 0x1b9   : > { %v1283_v53 = vmax.f32 %v1584_v45, 0.0  ;;  %v1285_v54 = vmax.f32 %v1592_v46, 0.0  ;;  %v1586_v55 = vadd.f32 %v1164_v51, %v366_v15  ;;  %v1594_v56 = vadd.f32 %v1270_v52, %v374_v16  ;;  %v1166_v57 = vpop.f32.mrb[7].mxu0  ;;  %v1272_v58 = vpop.f32.mrb[7].mxu1 }
 0x1ba   : > { %v1284_v59 = vmax.f32 %v1585_v49, 0.0  ;;  %v1286_v60 = vmax.f32 %v1593_v50, 0.0  ;;  %v1587_v61 = vadd.f32 %v1166_v57, %v370_v17  ;;  %v1595_v62 = vadd.f32 %v1272_v58, %v378_v18 }
 0x1bb   : > { %1299 = vst [vmem:[%s2249_s10 + $0x40] sm:$0xff] %v1283_v53  ;;  %1301 = vst [vmem:[%s2249_s10 + $0x50] sm:$0xff] %v1285_v54  ;;  %v1287_v63 = vmax.f32 %v1586_v55, 0.0  ;;  %v1289_v0 = vmax.f32 %v1594_v56, 0.0 }
 0x1bc   : > { %1300 = vst [vmem:[%s2249_s10 + $0x48] sm:$0xff] %v1284_v59  ;;  %1302 = vst [vmem:[%s2249_s10 + $0x58] sm:$0xff] %v1286_v60  ;;  %v1288_v1 = vmax.f32 %v1587_v61, 0.0  ;;  %v1290_v2 = vmax.f32 %v1595_v62, 0.0 }
 0x1bd   : > { %1303 = vst [vmem:[%s2249_s10 + $0x60] sm:$0xff] %v1287_v63  ;;  %1305 = vst [vmem:[%s2249_s10 + $0x70] sm:$0xff] %v1289_v0 }
 0x1be   : > { %1304 = vst [vmem:[%s2249_s10 + $0x68] sm:$0xff] %v1288_v1  ;;  %1306 = vst [vmem:[%s2249_s10 + $0x78] sm:$0xff] %v1290_v2 }
 0x1bf   : > { %1964 = shalt.err (!%p1961_p5)
}
 0x1c0   : > { %s1965_s29 = scalar_lea.hbm %s2266_s19, 2048  ;;  %s1969_s20 = scalar_lea.hbm %s2325_s3, 6144 }
 0x1c1   : > { %p1966_p9 = scmp.ne.s32.totalorder %s2266_s19, %s1965_s29  ;;  %p1970_p3 = scmp.lt.u32.totalorder %s2266_s19, %s2325_s3 }
 0x1c2   : > { %p1971_p7 = scmp.lt.u32.totalorder %s1969_s20, %s1965_s29  ;;  %p1973_p4 = scmp.lt.u32.totalorder %s1965_s29, %s2266_s19 }
 0x1c3   : > { %p1967_p1 = pnand %p1966_p9, %p2164_p11 }
 0x1c4   : > { %p1972_p13 = por %p1971_p7, %p1970_p3 }
 0x1c5   : > { %p1968_p2 = pneg %p1967_p1 }
 0x1c6   : > { %p1974_p6 = por %p1973_p4, %p1972_p13 }
 0x1c8   : > { %p1975_p8 = pnand %p1974_p6, %p1968_p2 }
 0x1ca   : > { %1978 = shalt.err (!%p1975_p8)
}
 0x1cb   : > { %s2044_s10 = smov 512   ;;  %s2045_s11 = smov 32  }
 0x1cc   : > { %1618 = dma.vmem_to_hbm [thread:$0]  (%p2164_p11), %s2268_s9, 2048, %s2266_s19, %s1308_s25, %s2044_s10, %s2044_s10, %s2045_s11  }
 0x1cd PF: > { %p1635_p12 = scmp.ge.s32.totalorder %s2037_s17, 2  ;;  %s1339_s15 = sand.u32 1, %s2017_s12  }
 0x1ce   : > { %p2343_p10 = scmp.ne.s32.totalorder %s2333_s23, 0  ;;  %s1340_s18 = scalar_lea.sflag [#allocation4], %s1339_s15 }
 0x1d0   : > { %p1629_p0 = pnand %p1635_p12, %p2343_p10 }
 0x1d2   : > { %2012 = dma.done.wait (!%p1629_p0), %s1340_s18, 2048  }
 0x1d3   : > { %2014 = vsyncadd (!%p1629_p0), %s1340_s18, 4294965248  ;;  %s20_s17 = sadd.s32 1, %s2037_s17   ;;  %s2344_s12 = smov %s2021_s13 }
 0x1d4   : > { %p17_p5 = scmp.ge.s32.totalorder %s20_s17, 5   ;;  %s2345_s13 = smov %s2025_s14 }
 0x1d5   : > { %s2346_s14 = smov %s2173_s5  ;;  %s2347_s15 = smov %s2033_s16 }
 0x1d6   : > { %s2348_s16 = smov %s2350_s28  ;;  %19 = sbr.rel (!%p17_p5) target bundleno = 7 (0x7), region = 81 }
 0x1dd   :  { %1345 = vsyncpa [#allocation3], 1 }
 0x1de   :  { %1347 = vsyncpa [#allocation3 + $0x1], 1 }
 0x1df   :  { %1348 = vsyncpa [#allocation6], 1 }
 0x1e0   :  { %1349 = vsyncpa [#allocation4], 1 }
 0x1e1   :  { %1351 = vsyncpa [#allocation4 + $0x1], 1 }

</bundles_post_ra>
